<compile_context>
chip_gen: v7x
topology: tpu7x:2x2x1
jax: 0.10.0
libtpu: 0.0.40
codegen_flags: <defaults>
</compile_context>

<pallas_src>
import functools

import jax
import jax.numpy as jnp
import numpy as np
from jax.experimental import pallas as pl
from jax.experimental.pallas import tpu as pltpu


# Deterministic "parameter init" (the module's __init__ takes `vocab`).
VOCAB = (3, 7, 11, 42, 100, 255)
MAX_V = max(VOCAB) + 1  # 256


def _tree_sum(terms):
    """Pairwise (balanced) sum to keep the add-dependency chain short."""
    terms = list(terms)
    while len(terms) > 1:
        nxt = []
        for a, b in zip(terms[0::2], terms[1::2]):
            nxt.append(a + b)
        if len(terms) % 2:
            nxt.append(terms[-1])
        terms = nxt
    return terms[0]


def make_integer_lookup(vocab=VOCAB, *, target_block_bytes=4 << 20):
    """Build the lookup callable with `vocab` baked in as immediates."""
    vocab = tuple(int(v) for v in vocab)
    # The module clamps x >= max_v to 0 before the table lookup.  Because 0 is not a
    # vocab id, table[0] == 0 and the clamp is redundant for the *result*: any id that
    # is OOV (>= max_v, or negative) fails every equality compare and maps to 0.
    assert 0 not in vocab, "clamp elision requires 0 not in vocab"

    def _lookup_kernel(x_ref, o_ref):
        # x_ref / o_ref: VMEM int32[block_rows, N]
        idx = x_ref[...]
        # Vocab ids are distinct => at most one term is nonzero per element.
        terms = [
            jnp.where(idx == jnp.int32(v), jnp.int32(j + 1), jnp.int32(0))
            for j, v in enumerate(vocab)
        ]
        o_ref[...] = _tree_sum(terms)

    def integer_lookup(x):
        x = x.astype(jnp.int32)
        orig_shape = x.shape
        # Flatten leading dims so the last dim stays lane-dense regardless of input rank.
        if x.ndim == 1:
            x2d = x.reshape(1, -1)
        else:
            x2d = x.reshape(-1, orig_shape[-1])
        B, N = x2d.shape

        # Pick the biggest row-block that fits the per-tile VMEM budget.  Input and
        # output tiles are each double-buffered (4 tiles live), so keep each a few MiB.
        rows_budget = max(1, target_block_bytes // (N * 4))
        if rows_budget >= B:
            block_rows = B            # single block: full array, grid of 1
        else:
            block_rows = max(8, (rows_budget // 8) * 8)  # respect (8,128) sublane tiling
        grid = (pl.cdiv(B, block_rows),)

        out2d = pl.pallas_call(
            _lookup_kernel,
            out_shape=jax.ShapeDtypeStruct((B, N), jnp.int32),
            grid_spec=pl.GridSpec(
                grid=grid,
                in_specs=[pl.BlockSpec((block_rows, N), lambda i: (i, 0))],
                out_specs=pl.BlockSpec((block_rows, N), lambda i: (i, 0)),
            ),
            compiler_params=pltpu.CompilerParams(
                dimension_semantics=("parallel",)),
        )(x2d)

        # Trailing embedding_dim=1 axis added outside the kernel (keeps the kernel's
        # output slab lane-dense; adding a trailing unit dim is metadata-only).
        return out2d.reshape(orig_shape + (1,))

    return integer_lookup


integer_lookup = make_integer_lookup(VOCAB)


def _reference(x_np):
    table = np.zeros((MAX_V,), dtype=np.int32)
    table[np.asarray(VOCAB)] = np.arange(1, len(VOCAB) + 1, dtype=np.int32)
    xc = x_np.copy()
    xc[xc >= MAX_V] = 0
    return table[xc][..., None]


if __name__ == "__main__":
    key = jax.random.PRNGKey(0)
    B, N = 16, 128
    # ids in [0, 512): mixes in-vocab, not-in-vocab, and OOV (>= MAX_V) values
    x = jax.random.randint(key, (B, N), 0, 512, dtype=jnp.int32)

    out = jax.block_until_ready(integer_lookup(x))

    ref = _reference(np.asarray(x))
    assert out.shape == (B, N, 1), out.shape
    np.testing.assert_array_equal(np.asarray(out), ref)
    print("KERNEL_OK")
</pallas_src>

<mosaic_0001>
module attributes {stable_mosaic.version = 11 : i64} {
  func.func @_lookup_kernel(%arg0: i32, %arg1: memref<16x128xi32, #tpu.memory_space<vmem>>, %arg2: memref<16x128xi32, #tpu.memory_space<vmem>>) attributes {dimension_semantics = [#tpu.dimension_semantics<parallel>], iteration_bounds = array<i64: 1>, scalar_prefetch = 0 : i64, scratch_operands = 0 : i64, tpu.core_type = #tpu.core_type<tc>, window_params = [{transform_indices = @transform_0, window_bounds = array<i64: 16, 128>}, {transform_indices = @transform_1, window_bounds = array<i64: 16, 128>}]} {
    %c0 = arith.constant 0 : index
    %c0_0 = arith.constant 0 : index
    %0 = vector.load %arg1[%c0, %c0_0] : memref<16x128xi32, #tpu.memory_space<vmem>>, vector<16x128xi32>
    %c3_i32 = arith.constant 3 : i32
    %1 = vector.broadcast %c3_i32 : i32 to vector<16x128xi32>
    %2 = arith.cmpi eq, %0, %1 : vector<16x128xi32>
    %c1_i32 = arith.constant 1 : i32
    %c0_i32 = arith.constant 0 : i32
    %3 = vector.broadcast %c1_i32 : i32 to vector<16x128xi32>
    %4 = vector.broadcast %c0_i32 : i32 to vector<16x128xi32>
    %5 = arith.select %2, %3, %4 : vector<16x128xi1>, vector<16x128xi32>
    %c7_i32 = arith.constant 7 : i32
    %6 = vector.broadcast %c7_i32 : i32 to vector<16x128xi32>
    %7 = arith.cmpi eq, %0, %6 : vector<16x128xi32>
    %c2_i32 = arith.constant 2 : i32
    %c0_i32_1 = arith.constant 0 : i32
    %8 = vector.broadcast %c2_i32 : i32 to vector<16x128xi32>
    %9 = vector.broadcast %c0_i32_1 : i32 to vector<16x128xi32>
    %10 = arith.select %7, %8, %9 : vector<16x128xi1>, vector<16x128xi32>
    %c11_i32 = arith.constant 11 : i32
    %11 = vector.broadcast %c11_i32 : i32 to vector<16x128xi32>
    %12 = arith.cmpi eq, %0, %11 : vector<16x128xi32>
    %c3_i32_2 = arith.constant 3 : i32
    %c0_i32_3 = arith.constant 0 : i32
    %13 = vector.broadcast %c3_i32_2 : i32 to vector<16x128xi32>
    %14 = vector.broadcast %c0_i32_3 : i32 to vector<16x128xi32>
    %15 = arith.select %12, %13, %14 : vector<16x128xi1>, vector<16x128xi32>
    %c42_i32 = arith.constant 42 : i32
    %16 = vector.broadcast %c42_i32 : i32 to vector<16x128xi32>
    %17 = arith.cmpi eq, %0, %16 : vector<16x128xi32>
    %c4_i32 = arith.constant 4 : i32
    %c0_i32_4 = arith.constant 0 : i32
    %18 = vector.broadcast %c4_i32 : i32 to vector<16x128xi32>
    %19 = vector.broadcast %c0_i32_4 : i32 to vector<16x128xi32>
    %20 = arith.select %17, %18, %19 : vector<16x128xi1>, vector<16x128xi32>
    %c100_i32 = arith.constant 100 : i32
    %21 = vector.broadcast %c100_i32 : i32 to vector<16x128xi32>
    %22 = arith.cmpi eq, %0, %21 : vector<16x128xi32>
    %c5_i32 = arith.constant 5 : i32
    %c0_i32_5 = arith.constant 0 : i32
    %23 = vector.broadcast %c5_i32 : i32 to vector<16x128xi32>
    %24 = vector.broadcast %c0_i32_5 : i32 to vector<16x128xi32>
    %25 = arith.select %22, %23, %24 : vector<16x128xi1>, vector<16x128xi32>
    %c255_i32 = arith.constant 255 : i32
    %26 = vector.broadcast %c255_i32 : i32 to vector<16x128xi32>
    %27 = arith.cmpi eq, %0, %26 : vector<16x128xi32>
    %c6_i32 = arith.constant 6 : i32
    %c0_i32_6 = arith.constant 0 : i32
    %28 = vector.broadcast %c6_i32 : i32 to vector<16x128xi32>
    %29 = vector.broadcast %c0_i32_6 : i32 to vector<16x128xi32>
    %30 = arith.select %27, %28, %29 : vector<16x128xi1>, vector<16x128xi32>
    %31 = arith.addi %5, %10 : vector<16x128xi32>
    %32 = arith.addi %15, %20 : vector<16x128xi32>
    %33 = arith.addi %25, %30 : vector<16x128xi32>
    %34 = arith.addi %31, %32 : vector<16x128xi32>
    %35 = arith.addi %34, %33 : vector<16x128xi32>
    %c0_7 = arith.constant 0 : index
    %c0_8 = arith.constant 0 : index
    %36 = vector.load %arg2[%c0_7, %c0_8] : memref<16x128xi32, #tpu.memory_space<vmem>>, vector<16x128xi32>
    tpu.vector_store %arg2[%c0_7, %c0_8], %35 {strides = array<i32>} : memref<16x128xi32, #tpu.memory_space<vmem>>, vector<16x128xi32>,
    return
  }
  func.func @transform_0(%arg0: i32) -> (i32, i32) {
    %c0_i32 = arith.constant 0 : i32
    %c0_i32_0 = arith.constant 0 : i32
    return %arg0, %c0_i32 : i32, i32
  }
  func.func @transform_1(%arg0: i32) -> (i32, i32) {
    %c0_i32 = arith.constant 0 : i32
    %c0_i32_0 = arith.constant 0 : i32
    return %arg0, %c0_i32 : i32, i32
  }
}

</mosaic_0001>

<bundles_post_ra>
// kernel: tpu_custom_call.1
= control target key start
LH: loop header
LB: loop body
LE: loop exit
PB: predicated region body
PF: predicated region fallthrough
CT: control target
= control target key end

     0   :  { %6 = vsyncpa [#allocation3], 0  ;;  %s176_s0 = inlined_call_operand.hbm [shape: s32[16,128], index: 0, kind: input, shape index: {}]   ;;  %s177_s1 = inlined_call_operand.hbm [shape: s32[16,128], index: 1, kind: output, shape index: {}]  }
   0x1   :  { %7 = vsyncpa [#allocation4], 0  ;;  %s131_s6 = smov [#allocation2]   ;;  %s83_s10 = scalar_lea.hbm %s176_s0, 256 }
   0x2   :  { %s13_s7 = sshll.u32 %s131_s6, 4  ;;  %p84_p0 = scmp.ne.s32.totalorder %s176_s0, %s83_s10  ;;  %s14_s7 = int_to_ptr.vmem [resolvable:$true] %s13_s7 }
   0x3   :  { %p87_p1 = scmp.lt.u32.totalorder %s83_s10, %s176_s0 }
   0x5   :  { %p89_p2 = pnand %p87_p1, %p84_p0 }
   0x7   :  { %92 = shalt.err (!%p89_p2)
}
   0x8   :  { %s93_s15 = scalar_lea.vmem %s14_s7, 256  ;;  %p98_p4 = scmp.lt.s32.totalorder %s14_s7, %s14_s7 }
   0x9   :  { %p94_p3 = scmp.ne.s32.totalorder %s14_s7, %s93_s15  ;;  %p99_p5 = scmp.lt.s32.totalorder %s93_s15, %s93_s15 }
   0xb   :  { %p100_p6 = por %p99_p5, %p98_p4 }
   0xd   :  { %p101_p7 = pnand %p100_p6, %p94_p3 }
   0xf   :  { %104 = shalt.err (!%p101_p7)
}
  0x10   :  { %s132_s16 = smov 128   ;;  %s133_s17 = smov 8  }
  0x11   :  { %19 = dma.hbm_to_vmem [thread:$0]  %s176_s0, 256, %s14_s7, [#allocation3], %s132_s16, %s132_s16, %s133_s17  }
  0x12   :  { %127 = dma.done.wait [#allocation3], 256  }
  0x13   :  { %128 = vsyncadd [#allocation3], 4294967040  ;;  %v23_v0 = vld [vmem:[#allocation2] sm:$0xff]  ;;  %v24_v1 = vld [vmem:[#allocation2 + $0x8] sm:$0xff]  ;;  %v134_v2 = vmov 0   ;;  %s135_s0 = smov [#allocation5]  }
  0x14   :  { %vm25_vm0 = vcmp.eq.s32.totalorder %v23_v0, 3  ;;  %vm29_vm1 = vcmp.eq.s32.totalorder %v23_v0, 7  ;;  %vm33_vm2 = vcmp.eq.s32.totalorder %v23_v0, 11  ;;  %vm37_vm3 = vcmp.eq.s32.totalorder %v23_v0, 42  ;;  %s66_s20 = sshll.u32 %s135_s0, 4  ;;  %s67_s20 = int_to_ptr.vmem [resolvable:$true] %s66_s20 }
  0x15   :  { %v27_v3 = vsel %vm25_vm0, 1, %v134_v2  ;;  %v31_v4 = vsel %vm29_vm1, 2, %v134_v2  ;;  %v35_v5 = vsel %vm33_vm2, 3, %v134_v2  ;;  %v39_v6 = vsel %vm37_vm3, 4, %v134_v2  ;;  %s105_s21 = scalar_lea.vmem %s67_s20, 256  ;;  %p110_p9 = scmp.lt.s32.totalorder %s67_s20, %s67_s20 }
  0x16   :  { %vm41_vm4 = vcmp.eq.s32.totalorder %v23_v0, 100  ;;  %vm45_vm5 = vcmp.eq.s32.totalorder %v23_v0, 255  ;;  %v49_v7 = vadd.s32 %v31_v4, %v27_v3  ;;  %v51_v8 = vadd.s32 %v39_v6, %v35_v5  ;;  %p106_p8 = scmp.ne.s32.totalorder %s67_s20, %s105_s21  ;;  %p111_p10 = scmp.lt.s32.totalorder %s105_s21, %s105_s21 }
  0x17   :  { %v43_v9 = vsel %vm41_vm4, 5, %v134_v2  ;;  %v47_v10 = vsel %vm45_vm5, 6, %v134_v2  ;;  %vm26_vm6 = vcmp.eq.s32.totalorder %v24_v1, 3  ;;  %vm30_vm7 = vcmp.eq.s32.totalorder %v24_v1, 7 }
  0x18   :  { %v53_v11 = vadd.s32 %v47_v10, %v43_v9  ;;  %v55_v12 = vadd.s32 %v51_v8, %v49_v7  ;;  %v28_v13 = vsel %vm26_vm6, 1, %v134_v2  ;;  %v32_v14 = vsel %vm30_vm7, 2, %v134_v2  ;;  %p112_p11 = por %p111_p10, %p110_p9 }
  0x19   :  { %vm34_vm8 = vcmp.eq.s32.totalorder %v24_v1, 11  ;;  %vm38_vm9 = vcmp.eq.s32.totalorder %v24_v1, 42  ;;  %vm42_vm10 = vcmp.eq.s32.totalorder %v24_v1, 100  ;;  %vm46_vm11 = vcmp.eq.s32.totalorder %v24_v1, 255 }
  0x1a   :  { %v57_v15 = vadd.s32 %v55_v12, %v53_v11  ;;  %v36_v16 = vsel %vm34_vm8, 3, %v134_v2  ;;  %v40_v17 = vsel %vm38_vm9, 4, %v134_v2  ;;  %v44_v18 = vsel %vm42_vm10, 5, %v134_v2  ;;  %p113_p12 = pnand %p112_p11, %p106_p8 }
  0x1b   :  { %v48_v19 = vsel %vm46_vm11, 6, %v134_v2  ;;  %v50_v20 = vadd.s32 %v32_v14, %v28_v13  ;;  %v52_v21 = vadd.s32 %v40_v17, %v36_v16 }
  0x1c   :  { %59 = vst [vmem:[#allocation5] sm:$0xff] %v57_v15  ;;  %v54_v22 = vadd.s32 %v48_v19, %v44_v18 }
  0x1d   :  { %v56_v23 = vadd.s32 %v52_v21, %v50_v20 }
  0x1f   :  { %v58_v24 = vadd.s32 %v56_v23, %v54_v22 }
  0x21   :  { %60 = vst [vmem:[#allocation5 + $0x8] sm:$0xff] %v58_v24 }
  0x22   :  { %116 = shalt.err (!%p113_p12)
}
  0x23   :  { %s117_s24 = scalar_lea.hbm %s177_s1, 256 }
  0x24   :  { %p118_p13 = scmp.ne.s32.totalorder %s177_s1, %s117_s24  ;;  %p121_p0 = scmp.lt.u32.totalorder %s117_s24, %s177_s1 }
  0x26   :  { %p123_p1 = pnand %p121_p0, %p118_p13 }
  0x28   :  { %126 = shalt.err (!%p123_p1)
}
  0x29   :  { %72 = dma.vmem_to_hbm [thread:$0]  %s67_s20, 256, %s177_s1, [#allocation4], %s132_s16, %s132_s16, %s133_s17  }
  0x2a   :  { %129 = dma.done.wait [#allocation4], 256  }
  0x2b   :  { %130 = vsyncadd [#allocation4], 4294967040 }
  0x2c   :  { %76 = vsyncpa [#allocation3], 1 }
  0x2d   :  { %77 = vsyncpa [#allocation4], 1 }

</bundles_post_ra>
